<compile_context>
chip_gen: v7x
topology: tpu7x:2x2x1
jax: 0.10.0
libtpu: 0.0.40
codegen_flags: <defaults>
</compile_context>

<pallas_src>
import functools
import numpy as np

import jax
import jax.numpy as jnp
from jax.experimental import pallas as pl
from jax.experimental.pallas import tpu as pltpu

B = 8        # batch_size (PPL default batch_size=8)
Z_DIM = 128  # latent z dim (lane-width aligned)
W_DIM = 128  # latent w dim (mapping-net output)
F_DIM = 128  # synthetic "LPIPS feature" dim


def _normalize_rows(x):
    # x / x.norm(dim=-1, keepdim=True)   (guarded against zero norm)
    return x * jax.lax.rsqrt(jnp.sum(x * x, axis=-1, keepdims=True) + 1e-12)


def _slerp(a, b, t):
    """Spherical interpolation (matches the torch `slerp` helper), with guards."""
    a = _normalize_rows(a)
    b = _normalize_rows(b)
    d = jnp.clip(jnp.sum(a * b, axis=-1, keepdims=True), -1.0, 1.0)
    p = t * jnp.arccos(d)
    c = _normalize_rows(b - d * a)
    out = a * jnp.cos(p) + c * jnp.sin(p)
    return _normalize_rows(out)


def _ppl_sampler_kernel(space, epsilon, bsz,
                        z_ref, t_ref, wmap_ref, v_ref, dist_ref):
    """Fused PPL sampler for one batch (one grid step).

    z_ref    : (2B, Z)  bf16 — rows [:B] are z0, rows [B:] are z1
    t_ref    : (B, 1)   f32  — only used on the 'z' (slerp) path
    wmap_ref : (Z, W)   bf16 — mapping-net weight (constant across grid)
    v_ref    : (1, W)   f32  — mean(wfeat, axis=1): folded gen+LPIPS stand-in head
    dist_ref : (1, 1, 128) f32 — per-batch distance broadcast across lanes
    """
    z = z_ref[...]
    wmap = wmap_ref[...]
    v = v_ref[...]                       # (1, W) f32

    if space == 'w':
        # One merged mapping matmul for z0 and z1 (bf16 MXU inputs, f32 accumulation).
        w = jnp.dot(z, wmap, preferred_element_type=jnp.float32)   # (2B, W)
        dw = w[bsz:, :] - w[:bsz, :]                               # w1 - w0 (static slices)
        # lerp finite difference through the linear head:
        #   lpips(wt1) - lpips(wt0) = ((t+eps) - t) * (w1 - w0) @ v = eps * (dw @ v)
        #   dist = sum((eps * dw@v)^2) / eps^2 = sum((dw @ v)^2)
        # t and eps cancel exactly; avoids the f32 cancellation of the naive FD at eps=1e-4.
        diff = jnp.sum(dw * v, axis=-1, keepdims=True)             # (B, 1)  VPU + lane reduce
        dist = jnp.sum(diff * diff, axis=0, keepdims=True)         # (1, 1)
    else:
        # TODO(synk): 'z' (slerp) path is implemented but not exercised in __main__
        # (module default space='w').
        t = t_ref[...]                                             # (B, 1) f32
        zf = z.astype(jnp.float32)
        z0, z1 = zf[:bsz, :], zf[bsz:, :]
        zt0 = _slerp(z0, z1, t)
        zt1 = _slerp(z0, z1, t + epsilon)
        zt = jnp.concatenate([zt0, zt1], axis=0).astype(wmap.dtype)
        wt = jnp.dot(zt, wmap, preferred_element_type=jnp.float32)  # (2B, W)
        lp = jnp.sum(wt * v, axis=-1, keepdims=True)                # (2B, 1)
        d = lp[:bsz, :] - lp[bsz:, :]
        dist = jnp.sum(d * d, axis=0, keepdims=True) / (epsilon * epsilon)

    # Lane-dense write: broadcast the per-batch scalar across the 128-lane output slab.
    dist_ref[...] = jnp.broadcast_to(dist.reshape(1, 1, 1), dist_ref.shape)


def ppl_sampler_batched(z, t, wmap, v_mean, *, space='w', epsilon=1e-4, batch_size=B):
    """One pallas_call for all batches.

    z      : (n_batches*2B, Z) bf16, per-batch layout [z0 rows; z1 rows]
    t      : (n_batches*B, 1)  f32
    wmap   : (Z, W)            bf16
    v_mean : (1, W)            f32
    returns: (n_batches,)      f32 per-batch PPL distances
    """
    total_rows, z_dim = z.shape
    two_b = 2 * batch_size
    n_batches = total_rows // two_b
    w_dim = wmap.shape[1]

    kernel = functools.partial(_ppl_sampler_kernel, space, epsilon, batch_size)
    out = pl.pallas_call(
        kernel,
        out_shape=jax.ShapeDtypeStruct((n_batches, 1, 128), jnp.float32),
        grid=(n_batches,),
        in_specs=[
            pl.BlockSpec((two_b, z_dim), lambda i: (i, 0)),        # per-batch z0/z1
            pl.BlockSpec((batch_size, 1), lambda i: (i, 0)),       # per-batch t
            pl.BlockSpec((z_dim, w_dim), lambda i: (0, 0)),        # weights stay VMEM-resident
            pl.BlockSpec((1, w_dim), lambda i: (0, 0)),            # folded LPIPS-head mean vector
        ],
        out_specs=pl.BlockSpec((1, 1, 128), lambda i: (i, 0, 0)),
        compiler_params=pltpu.CompilerParams(
            dimension_semantics=("parallel",)),                    # batches split across TCs on v7x
    )(z, t, wmap, v_mean)
    return out[:, 0, 0]


def ppl_sampler_ref(z_bf16, wmap_bf16, v_mean, n_batches, bsz):
    """Pure-JAX reference of the 'w'-space sampler (same bf16-MXU / f32-acc math)."""
    w = jnp.dot(z_bf16, wmap_bf16, preferred_element_type=jnp.float32)  # (n*2B, W)
    w = w.reshape(n_batches, 2, bsz, -1)
    dw = w[:, 1] - w[:, 0]                                              # (n, B, W)
    diff = jnp.sum(dw * v_mean, axis=-1)                                # (n, B)
    return jnp.sum(diff * diff, axis=-1)                                # (n,)


if __name__ == "__main__":
    # PPL config (constructor args): space='w', sampling='full', epsilon=1e-4 (module default —
    # the direct finite-difference formulation is well conditioned, no need to enlarge it).
    epsilon = 1e-4
    n_samples = 32
    batch_size = B
    n_batches = n_samples // batch_size

    key = jax.random.PRNGKey(0)
    key, k_map, k_feat, k_z, k_t = jax.random.split(key, 5)

    # Deterministic synthetic parameters (mapping net + gen/LPIPS stand-in head).
    wmap = jax.random.normal(k_map, (Z_DIM, W_DIM), jnp.float32) / np.sqrt(Z_DIM)
    wfeat = jax.random.normal(k_feat, (W_DIM, F_DIM), jnp.float32) / np.sqrt(W_DIM)
    # mean(wt @ wfeat, axis=-1) == wt @ mean(wfeat, axis=1): fold the head on host.
    v_mean = jnp.mean(wfeat, axis=1).reshape(1, W_DIM)                  # (1, W) f32

    # All batches stacked: per batch i, rows [2B*i : 2B*i+B] = z0, next B rows = z1.
    z = jax.random.normal(k_z, (n_batches * 2 * batch_size, Z_DIM), jnp.float32)
    # sampling == 'full'  ->  t ~ U[0, 1)
    t = jax.random.uniform(k_t, (n_batches * batch_size, 1), jnp.float32)

    # bf16 MXU inputs, f32 accumulation (elementwise math stays f32 in-kernel).
    z_bf16 = z.astype(jnp.bfloat16)
    wmap_bf16 = wmap.astype(jnp.bfloat16)

    dist = ppl_sampler_batched(z_bf16, t, wmap_bf16, v_mean,
                               space='w', epsilon=epsilon, batch_size=batch_size)
    dist = jax.block_until_ready(dist)

    # Single correctness check (single device->host sync), outside any hot loop.
    dist_ref = ppl_sampler_ref(z_bf16, wmap_bf16, v_mean, n_batches, batch_size)
    np.testing.assert_allclose(np.asarray(dist), np.asarray(dist_ref),
                               rtol=1e-3, atol=1e-6)

    # Host-side tail of PPL.forward: percentile clipping + mean (numpy, as in original).
    dist_np = np.asarray(dist)[:n_samples]
    lo = np.percentile(dist_np, 1, method='lower')
    hi = np.percentile(dist_np, 99, method='higher')
    ppl_value = np.extract(np.logical_and(dist_np >= lo, dist_np <= hi), dist_np).mean()

    assert np.isfinite(ppl_value)
    print("KERNEL_OK")
</pallas_src>

<mosaic_0001>
module attributes {stable_mosaic.version = 11 : i64} {
  func.func @_ppl_sampler_kernel(%arg0: i32, %arg1: memref<16x128xbf16, #tpu.memory_space<vmem>>, %arg2: memref<8x1xf32, #tpu.memory_space<vmem>>, %arg3: memref<128x128xbf16, #tpu.memory_space<vmem>>, %arg4: memref<1x128xf32, #tpu.memory_space<vmem>>, %arg5: memref<1x1x128xf32, #tpu.memory_space<vmem>>) attributes {dimension_semantics = [#tpu.dimension_semantics<parallel>], iteration_bounds = array<i64: 4>, scalar_prefetch = 0 : i64, scratch_operands = 0 : i64, tpu.core_type = #tpu.core_type<tc>, window_params = [{transform_indices = @transform_0, window_bounds = array<i64: 16, 128>}, {transform_indices = @transform_1, window_bounds = array<i64: 8, 1>}, {pipeline_mode = #tpu.pipeline_mode<synchronous>, transform_indices = @transform_2, window_bounds = array<i64: 128, 128>}, {pipeline_mode = #tpu.pipeline_mode<synchronous>, transform_indices = @transform_3, window_bounds = array<i64: 1, 128>}, {transform_indices = @transform_4, window_bounds = array<i64: 1, 1, 128>}]} {
    %c0 = arith.constant 0 : index
    %c0_0 = arith.constant 0 : index
    %0 = vector.load %arg1[%c0, %c0_0] : memref<16x128xbf16, #tpu.memory_space<vmem>>, vector<16x128xbf16>
    %c0_1 = arith.constant 0 : index
    %c0_2 = arith.constant 0 : index
    %1 = vector.load %arg3[%c0_1, %c0_2] : memref<128x128xbf16, #tpu.memory_space<vmem>>, vector<128x128xbf16>
    %c0_3 = arith.constant 0 : index
    %c0_4 = arith.constant 0 : index
    %2 = vector.load %arg4[%c0_3, %c0_4] : memref<1x128xf32, #tpu.memory_space<vmem>>, vector<1x128xf32>
    %cst = arith.constant dense<0.000000e+00> : vector<16x128xf32>
    %3 = tpu.matmul %0, %1, %cst {dimension_numbers = #tpu.dot_dimension_numbers<[1], [0], [0], [1], [0, 0, 1, 1], [], []>} : vector<16x128xbf16>, vector<128x128xbf16>, vector<16x128xf32> -> vector<16x128xf32>
    %4 = vector.extract_strided_slice %3 {offsets = [8, 0], sizes = [8, 128], strides = [1, 1]} : vector<16x128xf32> to vector<8x128xf32>
    %5 = vector.extract_strided_slice %3 {offsets = [0, 0], sizes = [8, 128], strides = [1, 1]} : vector<16x128xf32> to vector<8x128xf32>
    %6 = arith.subf %4, %5 : vector<8x128xf32>
    %7 = vector.broadcast %2 : vector<1x128xf32> to vector<8x128xf32>
    %8 = arith.mulf %6, %7 : vector<8x128xf32>
    %cst_5 = arith.constant dense<0.000000e+00> : vector<8xf32>
    %9 = vector.multi_reduction <add>, %8, %cst_5 [1] : vector<8x128xf32> to vector<8xf32>
    %10 = vector.shape_cast %9 : vector<8xf32> to vector<8x1xf32>
    %11 = arith.mulf %10, %10 : vector<8x1xf32>
    %cst_6 = arith.constant dense<0.000000e+00> : vector<1xf32>
    %12 = vector.multi_reduction <add>, %11, %cst_6 [0] : vector<8x1xf32> to vector<1xf32>
    %13 = vector.shape_cast %12 : vector<1xf32> to vector<1x1xf32>
    %14 = vector.shape_cast %13 : vector<1x1xf32> to vector<1x1x1xf32>
    %15 = vector.shape_cast %14 : vector<1x1x1xf32> to vector<1x1x1xf32>
    %16 = vector.broadcast %15 : vector<1x1x1xf32> to vector<1x1x128xf32>
    %c0_7 = arith.constant 0 : index
    %c0_8 = arith.constant 0 : index
    %c0_9 = arith.constant 0 : index
    %17 = vector.load %arg5[%c0_7, %c0_8, %c0_9] : memref<1x1x128xf32, #tpu.memory_space<vmem>>, vector<1x1x128xf32>
    tpu.vector_store %arg5[%c0_7, %c0_8, %c0_9], %16 {strides = array<i32>} : memref<1x1x128xf32, #tpu.memory_space<vmem>>, vector<1x1x128xf32>,
    return
  }
  func.func @transform_0(%arg0: i32) -> (i32, i32) {
    %c0_i32 = arith.constant 0 : i32
    %c0_i32_0 = arith.constant 0 : i32
    return %arg0, %c0_i32 : i32, i32
  }
  func.func @transform_1(%arg0: i32) -> (i32, i32) {
    %c0_i32 = arith.constant 0 : i32
    %c0_i32_0 = arith.constant 0 : i32
    return %arg0, %c0_i32 : i32, i32
  }
  func.func @transform_2(%arg0: i32) -> (i32, i32) {
    %c0_i32 = arith.constant 0 : i32
    %c0_i32_0 = arith.constant 0 : i32
    %c0_i32_1 = arith.constant 0 : i32
    return %c0_i32, %c0_i32_0 : i32, i32
  }
  func.func @transform_3(%arg0: i32) -> (i32, i32) {
    %c0_i32 = arith.constant 0 : i32
    %c0_i32_0 = arith.constant 0 : i32
    %c0_i32_1 = arith.constant 0 : i32
    return %c0_i32, %c0_i32_0 : i32, i32
  }
  func.func @transform_4(%arg0: i32) -> (i32, i32, i32) {
    %c0_i32 = arith.constant 0 : i32
    %c0_i32_0 = arith.constant 0 : i32
    %c0_i32_1 = arith.constant 0 : i32
    return %arg0, %c0_i32, %c0_i32_0 : i32, i32, i32
  }
}

</mosaic_0001>

<bundles_post_ra>
// kernel: tpu_custom_call.1
= control target key start
LH: loop header
LB: loop body
LE: loop exit
PB: predicated region body
PF: predicated region fallthrough
CT: control target
= control target key end

     0   :  { %9 = vsyncpa [#allocation3], 0  ;;  %s831_s0 = inlined_call_operand.vmem [shape: bf16[64,128], index: 0, kind: input, shape index: {}]   ;;  %s832_s1 = inlined_call_operand.vmem [shape: f32[32,1], index: 1, kind: input, shape index: {}]   ;;  %s833_s2 = inlined_call_operand.hbm [shape: bf16[128,128], index: 2, kind: input, shape index: {}]   ;;  %s834_s3 = inlined_call_operand.vmem [shape: f32[1,128], index: 3, kind: input, shape index: {}]   ;;  %s835_s4 = inlined_call_operand.hbm [shape: f32[4,1,128], index: 4, kind: output, shape index: {}]  }
   0x1   :  { %10 = vsyncpa [#allocation4], 0 }
   0x2   :  { %12 = vsyncpa [#allocation4 + $0x1], 0  ;;  %s694_s15 = smov 0   ;;  %s696_s16 = smov 0  }
   0x3   :  { %s698_s17 = smov 0   ;;  %s700_s18 = smov 0  }
   0x4 LB: > { %s715_s1 = sadd.s32 4294967295, %s661_s18   ;;  %s454_s19 = sadd.s32 4294967294, %s661_s18   ;;  %s661_s18 = sphi %s700_s18, %s851_s18   ;;  %s657_s17 = sphi %s698_s17, %s850_s17   ;;  %s653_s16 = sphi %s696_s16, %s849_s16   ;;  %s649_s15 = sphi %s694_s15, %s848_s15  }
   0x5   : > { %s719_s20 = sadd.s32 1, %s661_s18   ;;  %s119_s21 = sadd.s32 1, %s657_s17 }
   0x6   : > { %s116_s22 = ssub.s32 %s661_s18, %s719_s20  ;;  %p129_p0 = scmp.ne.s32.totalorder %s657_s17, %s653_s16 }
   0x7   : > { %p117_p1 = scmp.eq.s32.totalorder %s116_s22, 0  ;;  %p130_p2 = scmp.eq.s32.totalorder %s715_s1, 3 }
   0x8   : > { %p135_p3 = scmp.ne.s32.totalorder %s653_s16, %s649_s15  ;;  %p136_p4 = scmp.eq.s32.totalorder %s454_s19, 3 }
   0x9   : > { %s730_s23 = scalar_select %p117_p1, %s657_s17, %s119_s21  }
   0xa   : > { %p732_p5 = por %p130_p2, %p129_p0  ;;  %p736_p6 = por %p136_p4, %p135_p3 }
   0xb   : > { %p455_p7 = scmp.ge.s32.totalorder %s661_s18, 1  ;;  %p143_p8 = scmp.lt.s32.totalorder %s661_s18, 5 }
   0xc   : > { %s839_s24 = scalar_select %p732_p5, 1, 0 }
   0xd   : > { %s840_s25 = scalar_select %p736_p6, 1, 0 }
   0xe   : > { %p836_p9 = scmp.eq.s32.totalorder %s715_s1, 0  ;;  %p743_p10 = pnand %p455_p7, %p143_p8 }
   0xf   : > { %s663_s27 = smov [#allocation2]   ;;  %s567_s6 = scalar_lea.hbm %s833_s2, 1024 }
  0x10   : > { %s841_s26 = scalar_select %p743_p10, 1, 0 }
  0x11   : > { %s155_s28 = sshll.u32 %s663_s27, 4  ;;  %p510_p11 = pneg %p743_p10  ;;  %s156_s28 = int_to_ptr.vmem [resolvable:$true] %s155_s28 }
  0x12   : > { %p568_p13 = scmp.ne.s32.totalorder %s833_s2, %s567_s6  ;;  %p574_p3 = scmp.lt.u32.totalorder %s567_s6, %s833_s2 }
  0x13   : > { %p751_p12 = pnand %p836_p9, %p510_p11 }
  0x15   : > { %p569_p0 = pneg %p751_p12 }
  0x17   : > { %p570_p1 = pnand %p569_p0, %p568_p13 }
  0x19   : > { %p571_p2 = pneg %p570_p1 }
  0x1b   : > { %p576_p4 = pnand %p574_p3, %p571_p2 }
  0x1d   : > { %579 = shalt.err (!%p576_p4)
}
  0x1e   : > { %s580_s11 = scalar_lea.vmem %s156_s28, 1024  ;;  %p588_p9 = scmp.lt.s32.totalorder %s156_s28, %s156_s28 }
  0x1f   : > { %p581_p7 = scmp.ne.s32.totalorder %s156_s28, %s580_s11  ;;  %p589_p6 = scmp.lt.s32.totalorder %s580_s11, %s580_s11 }
  0x21   : > { %p583_p8 = pnand %p581_p7, %p569_p0  ;;  %p590_p5 = por %p589_p6, %p588_p9 }
  0x23   : > { %p584_p11 = pneg %p583_p8 }
  0x25   : > { %p591_p10 = pnand %p590_p5, %p584_p11 }
  0x27   : > { %594 = shalt.err (!%p591_p10)
}
  0x28   : > { %s664_s12 = smov 64   ;;  %s665_s13 = smov 4  }
  0x29   : > { %513 = dma.hbm_to_vmem [thread:$0]  (!%p751_p12), %s833_s2, 1024, %s156_s28, [#allocation3], %s664_s12, %s664_s12, %s665_s13  }
  0x2a   : > { %p843_p13 = scmp.ne.s32.totalorder %s841_s26, 0 }
  0x2b   : > { %p844_p1 = scmp.eq.s32.totalorder (!%p843_p13), %s715_s1, 0 }
  0x2c   : > { %190 = sbr.rel (%p843_p13) target bundleno = 473 (0x1d9), region = 36 }
  0x33   : > { %640 = dma.done.wait (%p844_p1), [#allocation3], 1024   ;;  %p845_p0 = pmov %p844_p1 }
  0x34   : > { %s460_s21 = sshll.u32 %s715_s1, 1  ;;  %v666_v0 = vmov 0.0   ;;  %vm667_vm0 = vmmov 0   ;;  %v558_v1 = vld [vmem:[#allocation2] sm:$0xff]   ;;  %v559_v2 = vld [vmem:[#allocation2 + $0x8] sm:$0xff]   ;;  %v560_v3 = vld [vmem:[#allocation2 + $0x10] sm:$0xff]  }
  0x35   : > { %642 = vsyncadd (%p845_p0), [#allocation3], 4294966272  ;;  %484 = vmatprep.subr.bf16.mxu0 %v666_v0  ;;  %500 = vmatprep.mubr.msk.bf16.mxu0 %vm667_vm0, %v666_v0  ;;  %p220_p5 = scmp.lt.s32.totalorder %s460_s21, 7  ;;  %v561_v4 = vld [vmem:[#allocation2 + $0x18] sm:$0xff]   ;;  %v562_v5 = vld [vmem:[#allocation2 + $0x20] sm:$0xff]   ;;  %s217_s5 = sand.u32 1, %s653_s16  }
  0x36   : > { %485 = vmatpush3.bf16.msra.mxu0 %v558_v1  ;;  %v563_v6 = vld [vmem:[#allocation2 + $0x28] sm:$0xff]   ;;  %v564_v7 = vld [vmem:[#allocation2 + $0x30] sm:$0xff]   ;;  %v565_v8 = vld [vmem:[#allocation2 + $0x38] sm:$0xff]   ;;  %s472_s6 = sshll.u32 %s715_s1, 4  ;;  %s218_s7 = scalar_lea.vmem [#allocation5], %s217_s5 }
  0x37   : > { %s853_s21 = smov (!%p220_p5, %s460_s21), 7  ;;  %486 = vmatprep.subr.bf16.mxu0 %v666_v0  ;;  %v471_v13 = vld [vmem:[%s834_s3] ss:$0 sm:$0xff]  ;;  %s375_s8 = sshll.u32 %s218_s7, 4  ;;  %s791_s8 = int_to_ptr.vmem [resolvable:$true] %s375_s8 }
  0x38   : > { %s461_s22 = sshll.u32 %s853_s21, 2  ;;  %s789_s11 = scalar_lea.hbm %s835_s4, %s472_s6 }
  0x39   : > { %s223_s28 = scalar_lea.vmem %s831_s0, %s461_s22  ;;  %s363_s12 = scalar_lea.sflag [#allocation4], %s217_s5 }
  0x3a   : > { %487 = vmatpush3.bf16.msra.mxu0 %v559_v2  ;;  %v566_v9 = vld [vmem:[%s223_s28] sm:$0xff]   ;;  %s595_s13 = scalar_lea.vmem %s791_s8, 16  ;;  %p846_p9 = scmp.ne.s32.totalorder %s839_s24, 0 }
  0x3b   : > { %488 = vmatprep.subr.bf16.mxu0 %v666_v0  ;;  %p596_p6 = scmp.ne.s32.totalorder %s791_s8, %s595_s13  ;;  %s668_s1 = smov [#allocation5]  }
  0x3c   : > { %s599_s14 = sshll.u32 %s668_s1, 4  ;;  %s600_s14 = int_to_ptr.vmem [resolvable:$false] %s599_s14 }
  0x3d   : > { %p597_p10 = pnand %p596_p6, %p846_p9  ;;  %s601_s19 = scalar_lea.vmem %s600_s14, 32 }
  0x3e   : > { %489 = vmatpush3.bf16.msra.mxu0 %v560_v3  ;;  %p602_p2 = scmp.lt.s32.totalorder %s791_s8, %s600_s14  ;;  %p603_p3 = scmp.lt.s32.totalorder %s601_s19, %s595_s13 }
  0x3f   : > { %490 = vmatprep.subr.bf16.mxu0 %v666_v0  ;;  %p598_p12 = pneg %p597_p10 }
  0x40   : > { %p604_p4 = por %p603_p3, %p602_p2 }
  0x42   : > { %491 = vmatpush3.bf16.msra.mxu0 %v561_v4  ;;  %p605_p7 = pnand %p604_p4, %p598_p12 }
  0x43   : > { %492 = vmatprep.subr.bf16.mxu0 %v666_v0 }
  0x46   : > { %493 = vmatpush3.bf16.msra.mxu0 %v562_v5 }
  0x47   : > { %494 = vmatprep.subr.bf16.mxu0 %v666_v0 }
  0x4a   : > { %495 = vmatpush3.bf16.msra.mxu0 %v563_v6 }
  0x4b   : > { %496 = vmatprep.subr.bf16.mxu0 %v666_v0 }
  0x4e   : > { %497 = vmatpush3.bf16.msra.mxu0 %v564_v7 }
  0x4f   : > { %498 = vmatprep.subr.bf16.mxu0 %v666_v0 }
  0x52   : > { %499 = vmatpush3.bf16.msra.mxu0 %v565_v8 }
  0x55   : > { %501 = vmatmul.mubr.bf16.vlgmr.msra.gmra.mrb[0].mxu0 %v566_v9 }
 0x128   : > { %v337_v10 = vpop.f32.mrb[0].mxu0 }
 0x129   : > { %v502_v11 = vpop.f32.mrb[1].mxu0 }
 0x12a   : > { %v340_v12 = vpop.f32.mrb[2].mxu0 }
 0x12b   : > { %v344_v14 = vsub.f32 %v340_v12, %v337_v10  ;;  %v503_v15 = vpop.f32.mrb[3].mxu0 }
 0x12d   : > { %v351_v16 = vmul.f32 %v471_v13, %v344_v14 }
 0x12f   : > { %352 = vadd.xlane.f32.xlu0 %v351_v16 }
 0x1bc   : > { %v353_v17 = vpop.xlane.xlu0 %352 }
 0x1bd   : > { %v354_v18 = vmul.f32 %v353_v17, %v353_v17 }
 0x1bf   : > { %v355_v19 = vrot.slane %v354_v18, 4 }
 0x1c1   : > { %v356_v20 = vadd.f32 %v355_v19, %v354_v18 }
 0x1c3   : > { %v357_v21 = vrot.slane %v356_v20, 2 }
 0x1c5   : > { %v358_v22 = vadd.f32 %v357_v21, %v356_v20 }
 0x1c7   : > { %v359_v23 = vrot.slane %v358_v22, 1 }
 0x1c9   : > { %v360_v24 = vadd.f32 %v359_v23, %v358_v22 }
 0x1cb   : > { %361 = vst [vmem:[%s218_s7] sm:$0x1] %v360_v24 }
 0x1cc   : > { %608 = shalt.err (!%p605_p7)
}
 0x1cd   : > { %s609_s21 = scalar_lea.hbm %s789_s11, 16  ;;  %s613_s27 = scalar_lea.hbm %s835_s4, 64 }
 0x1ce   : > { %p610_p8 = scmp.ne.s32.totalorder %s789_s11, %s609_s21  ;;  %p614_p1 = scmp.lt.u32.totalorder %s789_s11, %s835_s4 }
 0x1cf   : > { %p615_p0 = scmp.lt.u32.totalorder %s613_s27, %s609_s21  ;;  %p617_p6 = scmp.lt.u32.totalorder %s609_s21, %s789_s11 }
 0x1d0   : > { %p611_p11 = pnand %p610_p8, %p846_p9 }
 0x1d1   : > { %p616_p5 = por %p615_p0, %p614_p1 }
 0x1d2   : > { %p612_p13 = pneg %p611_p11 }
 0x1d3   : > { %p618_p10 = por %p617_p6, %p616_p5 }
 0x1d5   : > { %p619_p12 = pnand %p618_p10, %p612_p13 }
 0x1d7   : > { %622 = shalt.err (!%p619_p12)
}
 0x1d8   : > { %508 = dma.vmem_to_hbm [thread:$0]  (%p846_p9), %s791_s8, 16, %s789_s11, %s363_s12  }
 0x1d9 PF: > { %p520_p2 = scmp.ge.s32.totalorder %s661_s18, 2  ;;  %s387_s30 = sand.u32 1, %s649_s15  }
 0x1da   : > { %p847_p3 = scmp.ne.s32.totalorder %s840_s25, 0  ;;  %s388_s5 = scalar_lea.sflag [#allocation4], %s387_s30 }
 0x1dc   : > { %p515_p4 = pnand %p520_p2, %p847_p3 }
 0x1de   : > { %644 = dma.done.wait (!%p515_p4), %s388_s5, 16  }
 0x1df   : > { %646 = vsyncadd (!%p515_p4), %s388_s5, 4294967280  ;;  %p15_p7 = scmp.ge.s32.totalorder %s719_s20, 6   ;;  %s848_s15 = smov %s653_s16 }
 0x1e0   : > { %s849_s16 = smov %s657_s17  ;;  %s850_s17 = smov %s730_s23 }
 0x1e1   : > { %s851_s18 = smov %s719_s20  ;;  %17 = sbr.rel (!%p15_p7) target bundleno = 4 (0x4), region = 79 }
 0x1e8   :  { %392 = vsyncpa [#allocation3], 1 }
 0x1e9   :  { %394 = vsyncpa [#allocation3 + $0x1], 1 }
 0x1ea   :  { %395 = vsyncpa [#allocation4], 1 }
 0x1eb   :  { %397 = vsyncpa [#allocation4 + $0x1], 1 }

</bundles_post_ra>
